<compile_context>
chip_gen: v6e
topology: v6e:2x2x1
jax: 0.10.0
libtpu: 0.0.40
codegen_flags: <defaults>
</compile_context>

<pallas_src>
from functools import partial

import jax
import jax.numpy as jnp
from jax import lax
from jax.experimental import pallas as pl
from jax.experimental.pallas import tpu as pltpu

KSIZE = 3
PAD = 1
LANE = 128


def _round_up(n, m):
    return ((n + m - 1) // m) * m


# --------------------- one-time weight / layout prep (NOT in hot path) ---------------------

def prep_glfc_params(params, image_hw):
    """Build block-Toeplitz conv weight (all kh taps concatenated along N -> one conv matmul),
    fold the global-avg-pool divisor into the feature Linear, lane-pad to multiples of 128 and
    cast matmul operands to bfloat16 (f32 accumulation happens in-kernel)."""
    Wc, bc, W1, b1, W2, b2 = params
    H, W = image_hw
    C_feat, C, _, _ = Wc.shape
    feat_dim = W1.shape[0]
    num_classes = W2.shape[0]

    Wp = W + 2 * PAD
    K_in = Wp * C
    K_pad = _round_up(K_in, LANE)
    N1 = W * C_feat
    N1_pad = _round_up(N1, LANE)
    NC_pad = _round_up(num_classes, LANE)

    # Block-Toeplitz conv weight, one [K_pad, N1_pad] block per kh, concatenated along N:
    #   wk[kh][(w+kw)*C + c, w*C_feat + f] = Wc[f, c, kh, kw]
    blocks = []
    for kh in range(KSIZE):
        m = jnp.zeros((Wp * C, N1), jnp.float32)
        for kw in range(KSIZE):
            A = Wc[:, :, kh, kw].T                                     # [C, C_feat]
            P = jnp.zeros((Wp, W), jnp.float32).at[
                jnp.arange(W) + kw, jnp.arange(W)].set(1.0)            # shifted "diagonal"
            m = m + jnp.kron(P, A)
        blocks.append(jnp.pad(m, ((0, K_pad - K_in), (0, N1_pad - N1))))
    wk = jnp.concatenate(blocks, axis=1).astype(jnp.bfloat16)          # [K_pad, KSIZE*N1_pad]

    bconv = jnp.pad(jnp.tile(bc, W), (0, N1_pad - N1)).reshape(1, N1_pad)            # f32
    p1 = jnp.pad(jnp.tile(W1.T / float(H * W), (W, 1)),
                 ((0, N1_pad - N1), (0, 0))).astype(jnp.bfloat16)      # pool folded into Linear1
    b1_row = b1.reshape(1, feat_dim)                                                 # f32
    w2p = jnp.pad(W2.T, ((0, 0), (0, NC_pad - num_classes))).astype(jnp.bfloat16)
    b2p = jnp.pad(b2.reshape(1, num_classes), ((0, 0), (0, NC_pad - num_classes)))   # f32
    return (wk, bconv, p1, b1_row, w2p, b2p)


# ----------------------------- per-call forward (jitted hot path) ---------------------------

def glfc_forward(x, prepped, *, num_classes):
    wk, bconv, p1, b1_row, w2p, b2p = prepped
    B, C, H, W = x.shape
    Hp, Wp = H + 2 * PAD, W + 2 * PAD
    Hp_pad = _round_up(Hp, 8)                  # sublane-aligned per-batch row stride (18 -> 24)
    B_pad = _round_up(max(B, 8), 8)
    K_in = Wp * C
    K_pad = wk.shape[0]
    N1_pad = wk.shape[1] // KSIZE
    feat_dim = p1.shape[1]
    NC_pad = w2p.shape[1]

    # Input layout: pad spatially, channels-last, one row per (b, padded_h), pad rows to Hp_pad
    # and lanes to K_pad, bf16 for the MXU.
    xp = jnp.pad(x, ((0, 0), (0, 0), (PAD, PAD), (PAD, PAD)))          # [B, C, Hp, Wp]
    x2d = xp.transpose(0, 2, 3, 1).reshape(B, Hp, Wp * C)              # [B, Hp, Wp*C]
    x2d = jnp.pad(x2d, ((0, 0), (0, Hp_pad - Hp), (0, K_pad - K_in)))  # [B, Hp_pad, K_pad]
    x2d = x2d.reshape(B * Hp_pad, K_pad).astype(jnp.bfloat16)

    def fused_kernel(x_ref, wk_ref, bconv_ref, p1_ref, b1_ref, w2_ref, b2_ref, o_ref):
        # (1) ONE conv matmul for all batches and all KSIZE row taps (bf16 MXU, f32 accum).
        y = jnp.dot(x_ref[...], wk_ref[...], preferred_element_type=jnp.float32)
        # (2) invariant loads hoisted out of the batch loop.
        bconv_v = bconv_ref[...]
        pooled_rows = []
        for b in range(B):                              # static unroll, B is tiny
            base = b * Hp_pad                           # multiple of 8 -> aligned sublane base
            acc = y[base:base + H, 0:N1_pad]
            for kh in range(1, KSIZE):
                acc = acc + y[base + kh:base + kh + H, kh * N1_pad:(kh + 1) * N1_pad]
            r = jnp.maximum(acc + bconv_v, 0.0)         # relu(conv + bias)          [H, N1_pad]
            # fold the H reduction BEFORE the feature matmul (cheap sublane reduce)
            pooled_rows.append(jnp.sum(r, axis=0, keepdims=True))                  # [1, N1_pad]
        if B_pad > B:
            pooled_rows.append(jnp.zeros((B_pad - B, N1_pad), jnp.float32))
        pooled = jnp.concatenate(pooled_rows, axis=0)                              # [B_pad, N1_pad]
        # (3) global-avg-pool + feature Linear (pool divisor folded into p1), then ReLU.
        feat = jnp.dot(pooled.astype(jnp.bfloat16), p1_ref[...],
                       preferred_element_type=jnp.float32) + b1_ref[...]
        feat = jnp.maximum(feat, 0.0)                                              # [B_pad, feat_dim]
        # (4) classifier Linear for ALL batches at once; single unmasked lane-dense store.
        logits = jnp.dot(feat.astype(jnp.bfloat16), w2_ref[...],
                         preferred_element_type=jnp.float32) + b2_ref[...]
        o_ref[...] = logits                                                        # [B_pad, NC_pad]

    operands = (x2d, wk, bconv, p1, b1_row, w2p, b2p)
    flops = (2 * (B * Hp_pad) * K_pad * (KSIZE * N1_pad)
             + 2 * B_pad * N1_pad * feat_dim
             + 2 * B_pad * feat_dim * NC_pad)
    bytes_accessed = (sum(int(a.size) * a.dtype.itemsize for a in operands)
                      + B_pad * NC_pad * 4)
    vmem = pltpu.MemorySpace.VMEM
    out = pl.pallas_call(
        fused_kernel,
        out_shape=jax.ShapeDtypeStruct((B_pad, NC_pad), jnp.float32),
        in_specs=[pl.BlockSpec(memory_space=vmem)] * len(operands),
        out_specs=pl.BlockSpec(memory_space=vmem),
        cost_estimate=pl.CostEstimate(flops=flops, transcendentals=0,
                                      bytes_accessed=bytes_accessed),
    )(*operands)
    return out[:B, :num_classes]


# ----------------------------- reference (pure JAX, f32) -------------------------

def glfc_reference(x, params):
    Wc, bc, W1, b1, W2, b2 = params
    conv = lax.conv_general_dilated(
        x, Wc, window_strides=(1, 1), padding="SAME",
        dimension_numbers=("NCHW", "OIHW", "NCHW"))
    conv = jax.nn.relu(conv + bc[None, :, None, None])
    pooled = conv.mean(axis=(2, 3))                      # [B, C_feat]
    feat = jax.nn.relu(pooled @ W1.T + b1)               # [B, feature_dim]
    return feat @ W2.T + b2                              # [B, num_classes]


# ----------------------------- main -----------------------------------------

if __name__ == "__main__":
    B, C, H, W = 2, 4, 16, 16
    C_feat = 8          # conv channels of the synthetic base model
    feature_dim = 32    # GLFCModel feature_dim
    num_classes = 10

    key = jax.random.PRNGKey(0)
    kx, k1, k2, k3, k4, k5, k6 = jax.random.split(key, 7)

    x = jax.random.normal(kx, (B, C, H, W), dtype=jnp.float32)

    # deterministic parameter init (PyTorch-shaped: Linear weights are [out, in])
    Wc = 0.1 * jax.random.normal(k1, (C_feat, C, KSIZE, KSIZE), dtype=jnp.float32)
    bc = 0.1 * jax.random.normal(k2, (C_feat,), dtype=jnp.float32)
    W1 = 0.1 * jax.random.normal(k3, (feature_dim, C_feat), dtype=jnp.float32)
    b1 = 0.1 * jax.random.normal(k4, (feature_dim,), dtype=jnp.float32)
    W2 = 0.1 * jax.random.normal(k5, (num_classes, feature_dim), dtype=jnp.float32)
    b2 = 0.1 * jax.random.normal(k6, (num_classes,), dtype=jnp.float32)
    params = (Wc, bc, W1, b1, W2, b2)

    # One-time weight/layout prep, cached; the per-step hot path is just layout + one pallas_call.
    prepped = prep_glfc_params(params, (H, W))
    prepped = jax.tree_util.tree_map(jax.block_until_ready, prepped)
    fwd = jax.jit(partial(glfc_forward, num_classes=num_classes))

    out = jax.block_until_ready(fwd(x, prepped))

    ref = glfc_reference(x, params)
    assert out.shape == (B, num_classes)
    # bf16 MXU operands (f32 accumulation) -> bf16-level tolerance vs the f32 reference.
    assert jnp.allclose(out, ref, rtol=2e-2, atol=2e-2), "Pallas output mismatch vs reference"

    print("KERNEL_OK")
</pallas_src>

<mosaic_0001>
module attributes {stable_mosaic.version = 11 : i64} {
  func.func @fused_kernel(%arg0: memref<48x128xbf16, #tpu.memory_space<vmem>>, %arg1: memref<128x384xbf16, #tpu.memory_space<vmem>>, %arg2: memref<1x128xf32, #tpu.memory_space<vmem>>, %arg3: memref<128x32xbf16, #tpu.memory_space<vmem>>, %arg4: memref<1x32xf32, #tpu.memory_space<vmem>>, %arg5: memref<32x128xbf16, #tpu.memory_space<vmem>>, %arg6: memref<1x128xf32, #tpu.memory_space<vmem>>, %arg7: memref<8x128xf32, #tpu.memory_space<vmem>>) attributes {dimension_semantics = [], scalar_prefetch = 0 : i64, scratch_operands = 0 : i64, tpu.core_type = #tpu.core_type<tc>} {
    %c0 = arith.constant 0 : index
    %c0_0 = arith.constant 0 : index
    %0 = vector.load %arg0[%c0, %c0_0] : memref<48x128xbf16, #tpu.memory_space<vmem>>, vector<48x128xbf16>
    %c0_1 = arith.constant 0 : index
    %c0_2 = arith.constant 0 : index
    %1 = vector.load %arg1[%c0_1, %c0_2] : memref<128x384xbf16, #tpu.memory_space<vmem>>, vector<128x384xbf16>
    %cst = arith.constant dense<0.000000e+00> : vector<48x384xf32>
    %2 = tpu.matmul %0, %1, %cst {dimension_numbers = #tpu.dot_dimension_numbers<[1], [0], [0], [1], [0, 0, 1, 1], [], []>} : vector<48x128xbf16>, vector<128x384xbf16>, vector<48x384xf32> -> vector<48x384xf32>
    %c0_3 = arith.constant 0 : index
    %c0_4 = arith.constant 0 : index
    %3 = vector.load %arg2[%c0_3, %c0_4] : memref<1x128xf32, #tpu.memory_space<vmem>>, vector<1x128xf32>
    %4 = vector.extract_strided_slice %2 {offsets = [0, 0], sizes = [16, 128], strides = [1, 1]} : vector<48x384xf32> to vector<16x128xf32>
    %5 = vector.extract_strided_slice %2 {offsets = [1, 128], sizes = [16, 128], strides = [1, 1]} : vector<48x384xf32> to vector<16x128xf32>
    %6 = arith.addf %4, %5 : vector<16x128xf32>
    %7 = vector.extract_strided_slice %2 {offsets = [2, 256], sizes = [16, 128], strides = [1, 1]} : vector<48x384xf32> to vector<16x128xf32>
    %8 = arith.addf %6, %7 : vector<16x128xf32>
    %9 = vector.broadcast %3 : vector<1x128xf32> to vector<16x128xf32>
    %10 = arith.addf %8, %9 : vector<16x128xf32>
    %cst_5 = arith.constant 0.000000e+00 : f32
    %11 = vector.broadcast %cst_5 : f32 to vector<16x128xf32>
    %12 = arith.maximumf %10, %11 : vector<16x128xf32>
    %cst_6 = arith.constant dense<0.000000e+00> : vector<128xf32>
    %13 = vector.multi_reduction <add>, %12, %cst_6 [0] : vector<16x128xf32> to vector<128xf32>
    %14 = vector.shape_cast %13 : vector<128xf32> to vector<1x128xf32>
    %15 = vector.extract_strided_slice %2 {offsets = [24, 0], sizes = [16, 128], strides = [1, 1]} : vector<48x384xf32> to vector<16x128xf32>
    %16 = vector.extract_strided_slice %2 {offsets = [25, 128], sizes = [16, 128], strides = [1, 1]} : vector<48x384xf32> to vector<16x128xf32>
    %17 = arith.addf %15, %16 : vector<16x128xf32>
    %18 = vector.extract_strided_slice %2 {offsets = [26, 256], sizes = [16, 128], strides = [1, 1]} : vector<48x384xf32> to vector<16x128xf32>
    %19 = arith.addf %17, %18 : vector<16x128xf32>
    %20 = vector.broadcast %3 : vector<1x128xf32> to vector<16x128xf32>
    %21 = arith.addf %19, %20 : vector<16x128xf32>
    %cst_7 = arith.constant 0.000000e+00 : f32
    %22 = vector.broadcast %cst_7 : f32 to vector<16x128xf32>
    %23 = arith.maximumf %21, %22 : vector<16x128xf32>
    %cst_8 = arith.constant dense<0.000000e+00> : vector<128xf32>
    %24 = vector.multi_reduction <add>, %23, %cst_8 [0] : vector<16x128xf32> to vector<128xf32>
    %25 = vector.shape_cast %24 : vector<128xf32> to vector<1x128xf32>
    %cst_9 = arith.constant 0.000000e+00 : f32
    %26 = vector.broadcast %cst_9 : f32 to vector<6x128xf32>
    %27 = tpu.concatenate %14, %25, %26 in 0 : vector<1x128xf32>, vector<1x128xf32>, vector<6x128xf32> -> vector<8x128xf32>
    %28 = arith.truncf %27 : vector<8x128xf32> to vector<8x128xbf16>
    %c0_10 = arith.constant 0 : index
    %c0_11 = arith.constant 0 : index
    %29 = vector.load %arg3[%c0_10, %c0_11] : memref<128x32xbf16, #tpu.memory_space<vmem>>, vector<128x32xbf16>
    %cst_12 = arith.constant dense<0.000000e+00> : vector<8x32xf32>
    %30 = tpu.matmul %28, %29, %cst_12 {dimension_numbers = #tpu.dot_dimension_numbers<[1], [0], [0], [1], [0, 0, 1, 1], [], []>} : vector<8x128xbf16>, vector<128x32xbf16>, vector<8x32xf32> -> vector<8x32xf32>
    %c0_13 = arith.constant 0 : index
    %c0_14 = arith.constant 0 : index
    %31 = vector.load %arg4[%c0_13, %c0_14] : memref<1x32xf32, #tpu.memory_space<vmem>>, vector<1x32xf32>
    %32 = vector.broadcast %31 : vector<1x32xf32> to vector<8x32xf32>
    %33 = arith.addf %30, %32 : vector<8x32xf32>
    %cst_15 = arith.constant 0.000000e+00 : f32
    %34 = vector.broadcast %cst_15 : f32 to vector<8x32xf32>
    %35 = arith.maximumf %33, %34 : vector<8x32xf32>
    %36 = arith.truncf %35 : vector<8x32xf32> to vector<8x32xbf16>
    %c0_16 = arith.constant 0 : index
    %c0_17 = arith.constant 0 : index
    %37 = vector.load %arg5[%c0_16, %c0_17] : memref<32x128xbf16, #tpu.memory_space<vmem>>, vector<32x128xbf16>
    %cst_18 = arith.constant dense<0.000000e+00> : vector<8x128xf32>
    %38 = tpu.matmul %36, %37, %cst_18 {dimension_numbers = #tpu.dot_dimension_numbers<[1], [0], [0], [1], [0, 0, 1, 1], [], []>} : vector<8x32xbf16>, vector<32x128xbf16>, vector<8x128xf32> -> vector<8x128xf32>
    %c0_19 = arith.constant 0 : index
    %c0_20 = arith.constant 0 : index
    %39 = vector.load %arg6[%c0_19, %c0_20] : memref<1x128xf32, #tpu.memory_space<vmem>>, vector<1x128xf32>
    %40 = vector.broadcast %39 : vector<1x128xf32> to vector<8x128xf32>
    %41 = arith.addf %38, %40 : vector<8x128xf32>
    %c0_21 = arith.constant 0 : index
    %c0_22 = arith.constant 0 : index
    %42 = vector.load %arg7[%c0_21, %c0_22] : memref<8x128xf32, #tpu.memory_space<vmem>>, vector<8x128xf32>
    tpu.vector_store %arg7[%c0_21, %c0_22], %41 {strides = array<i32>} : memref<8x128xf32, #tpu.memory_space<vmem>>, vector<8x128xf32>,
    return
  }
}

</mosaic_0001>

<bundles_post_ra>
// kernel: glfc_forward.1
= control target key start
LH: loop header
LB: loop body
LE: loop exit
PB: predicated region body
PF: predicated region fallthrough
CT: control target
= control target key end

     0   :  { %v769_v0 = vmov 0.0   ;;  %vm770_vm0 = vmmov 0   ;;  %v771_v3 = vmov 0   ;;  %vm333_vm1 = vcmask 1046528   ;;  %s974_s1 = inlined_call_operand.vmem [shape: bf16[128,384], index: 1, kind: input, shape index: {}]   ;;  %s975_s0 = inlined_call_operand.vmem [shape: bf16[48,128], index: 0, kind: input, shape index: {}]   ;;  %s976_s3 = inlined_call_operand.vmem [shape: bf16[128,32], index: 3, kind: input, shape index: {}]   ;;  %s977_s5 = inlined_call_operand.vmem [shape: bf16[32,128], index: 5, kind: input, shape index: {}]   ;;  %s978_s2 = inlined_call_operand.vmem [shape: f32[1,128], index: 2, kind: input, shape index: {}]   ;;  %s979_s4 = inlined_call_operand.vmem [shape: f32[1,32], index: 4, kind: input, shape index: {}]   ;;  %s980_s6 = inlined_call_operand.vmem [shape: f32[1,128], index: 6, kind: input, shape index: {}]   ;;  %s981_s7 = inlined_call_operand.vmem [shape: f32[8,128], index: 7, kind: output, shape index: {}]  }
   0x1   :  { %665 = vmatprep.subr.bf16.mxu1 %v769_v0  ;;  %v724_v1 = vld [vmem:[%s974_s1 + $0xac] ss:$12 sps:$4 sm:$0xff]   ;;  %681 = vmatprep.mubr.msk.bf16.mxu1 %vm770_vm0, %v769_v0  ;;  %v726_v2 = vld [vmem:[%s974_s1 + $0xb0] ss:$12 sps:$4 sm:$0xff]   ;;  %v727_v4 = vld [vmem:[%s974_s1 + $0xa8] ss:$12 sps:$4 sm:$0xff]  }
   0x2   :  { %243 = vmatprep.mubr.bf16.mxu0 %v771_v3  ;;  %211 = vmatprep.subr.bf16.mxu0 %v724_v1  ;;  %v728_v5 = vld [vmem:[%s974_s1 + $0x94] ss:$12 sps:$4 sm:$0xff]   ;;  %v730_v6 = vld [vmem:[%s974_s1 + $0x98] ss:$12 sps:$4 sm:$0xff]   ;;  %v731_v7 = vld [vmem:[%s974_s1 + $0x90] ss:$12 sps:$4 sm:$0xff]  }
   0x3   :  { %666 = vmatpush3.bf16.msra.mxu1 %v726_v2  ;;  %212 = vmatpush1.bf16.msra.mxu0 %v727_v4  ;;  %v732_v8 = vld [vmem:[%s974_s1 + $0x7c] ss:$12 sps:$4 sm:$0xff]   ;;  %v734_v9 = vld [vmem:[%s974_s1 + $0x80] ss:$12 sps:$4 sm:$0xff]   ;;  %v735_v10 = vld [vmem:[%s974_s1 + $0x78] ss:$12 sps:$4 sm:$0xff]  }
   0x4   :  { %667 = vmatprep.subr.bf16.mxu1 %v769_v0  ;;  %213 = vmatprep.subr.bf16.mxu0 %v728_v5  ;;  %v736_v11 = vld [vmem:[%s974_s1 + $0x64] ss:$12 sps:$4 sm:$0xff]   ;;  %v738_v12 = vld [vmem:[%s974_s1 + $0x68] ss:$12 sps:$4 sm:$0xff]   ;;  %v739_v13 = vld [vmem:[%s974_s1 + $0x60] ss:$12 sps:$4 sm:$0xff]  }
   0x5   :  { %v740_v14 = vld [vmem:[%s974_s1 + $0x4c] ss:$12 sps:$4 sm:$0xff]   ;;  %v742_v15 = vld [vmem:[%s974_s1 + $0x50] ss:$12 sps:$4 sm:$0xff]   ;;  %v743_v16 = vld [vmem:[%s974_s1 + $0x48] ss:$12 sps:$4 sm:$0xff]  }
   0x6   :  { %v744_v17 = vld [vmem:[%s974_s1 + $0x34] ss:$12 sps:$4 sm:$0xff]   ;;  %v746_v18 = vld [vmem:[%s974_s1 + $0x38] ss:$12 sps:$4 sm:$0xff]   ;;  %v747_v19 = vld [vmem:[%s974_s1 + $0x30] ss:$12 sps:$4 sm:$0xff]  }
   0x7   :  { %668 = vmatpush3.bf16.msra.mxu1 %v730_v6  ;;  %214 = vmatpush1.bf16.msra.mxu0 %v731_v7  ;;  %v748_v20 = vld [vmem:[%s974_s1 + $0x1c] ss:$12 sps:$4 sm:$0xff]   ;;  %v750_v21 = vld [vmem:[%s974_s1 + $0x20] ss:$12 sps:$4 sm:$0xff]   ;;  %v751_v22 = vld [vmem:[%s974_s1 + $0x18] ss:$12 sps:$4 sm:$0xff]  }
   0x8   :  { %669 = vmatprep.subr.bf16.mxu1 %v769_v0  ;;  %215 = vmatprep.subr.bf16.mxu0 %v732_v8  ;;  %v752_v23 = vld [vmem:[%s974_s1 + $0x4] ss:$12 sps:$4 sm:$0xff]   ;;  %v754_v24 = vld [vmem:[%s974_s1 + $0x8] ss:$12 sps:$4 sm:$0xff]   ;;  %v755_v25 = vld [vmem:[%s974_s1] ss:$12 sps:$4 sm:$0xff]  }
   0x9   :  { %v756_v26 = vld [vmem:[%s975_s0] sm:$0xff]   ;;  %v757_v27 = vld [vmem:[%s975_s0 + $0x8] sm:$0xff]   ;;  %v758_v28 = vld [vmem:[%s975_s0 + $0x10] sm:$0xff]   ;;  %vm346_vm2 = vcmask 1045504   ;;  %vm408_vm3 = vcmask 1040384   ;;  %vm410_vm4 = vcmask 1041408  }
   0xa   :  { %v759_v29 = vld [vmem:[%s976_s3 + $0x38] sm:$0xff]   ;;  %v760_v30 = vld [vmem:[%s976_s3 + $0x30] sm:$0xff]   ;;  %v761_v31 = vld [vmem:[%s976_s3 + $0x28] sm:$0xff]   ;;  %vm549_vm6 = vcmask 261120  }
   0xb   :  { %670 = vmatpush3.bf16.msra.mxu1 %v734_v9  ;;  %216 = vmatpush1.bf16.msra.mxu0 %v735_v10  ;;  %v762_v32 = vld [vmem:[%s976_s3 + $0x20] sm:$0xff]   ;;  %v763_v33 = vld [vmem:[%s976_s3 + $0x18] sm:$0xff]   ;;  %v764_v34 = vld [vmem:[%s976_s3 + $0x10] sm:$0xff]  }
   0xc   :  { %671 = vmatprep.subr.bf16.mxu1 %v769_v0  ;;  %217 = vmatprep.subr.bf16.mxu0 %v736_v11  ;;  %v765_v35 = vld [vmem:[%s976_s3 + $0x8] sm:$0xff]   ;;  %v766_v36 = vld [vmem:[%s976_s3] sm:$0xff]   ;;  %vm635_vm5 = vmpackc.low %vm410_vm4, %vm410_vm4 }
   0xd   :  { %v767_v37 = vld [vmem:[%s977_s5 + $0x8] sm:$0xff]   ;;  %v768_v38 = vld [vmem:[%s977_s5] sm:$0xff]  }
   0xe   :  { %v625_v63 = vld [vmem:[%s978_s2] ss:$0 sm:$0xff] }
   0xf   :  { %672 = vmatpush3.bf16.msra.mxu1 %v738_v12  ;;  %218 = vmatpush1.bf16.msra.mxu0 %v739_v13 }
  0x10   :  { %673 = vmatprep.subr.bf16.mxu1 %v769_v0  ;;  %219 = vmatprep.subr.bf16.mxu0 %v740_v14 }
  0x13   :  { %674 = vmatpush3.bf16.msra.mxu1 %v742_v15  ;;  %220 = vmatpush1.bf16.msra.mxu0 %v743_v16 }
  0x14   :  { %675 = vmatprep.subr.bf16.mxu1 %v769_v0  ;;  %221 = vmatprep.subr.bf16.mxu0 %v744_v17 }
  0x17   :  { %676 = vmatpush3.bf16.msra.mxu1 %v746_v18  ;;  %222 = vmatpush1.bf16.msra.mxu0 %v747_v19 }
  0x18   :  { %677 = vmatprep.subr.bf16.mxu1 %v769_v0  ;;  %223 = vmatprep.subr.bf16.mxu0 %v748_v20 }
  0x1b   :  { %678 = vmatpush3.bf16.msra.mxu1 %v750_v21  ;;  %224 = vmatpush1.bf16.msra.mxu0 %v751_v22 }
  0x1c   :  { %679 = vmatprep.subr.bf16.mxu1 %v769_v0  ;;  %225 = vmatprep.subr.bf16.mxu0 %v752_v23 }
  0x1f   :  { %680 = vmatpush3.bf16.msra.mxu1 %v754_v24  ;;  %226 = vmatpush1.bf16.msra.mxu0 %v755_v25 }
  0x20   :  { %713 = vmatprep.subr.bf16.mxu1 %v769_v0  ;;  %693 = vmatprep.subr.bf16.mxu0 %v769_v0 }
  0x22   :  { %682 = vmatmul.mubr.bf16.vlgmr.msra.gmra.mxu1 %v756_v26  ;;  %244 = vmatmul.mubr.bf16.vlgmr.msra.gmra.mxu0 %v756_v26 }
  0x23   :  { %685 = vmatprep.mubr.msk.bf16.mxu1 %vm770_vm0, %v769_v0  ;;  %253 = vmatprep.mubr.bf16.mxu0 %v771_v3 }
  0x24   :  { %694 = vmatpush3.bf16.msra.mxu0 %v759_v29  ;;  %714 = vmatpush3.bf16.msra.mxu1 %v767_v37 }
  0x25   :  { %695 = vmatprep.subr.bf16.mxu0 %v769_v0  ;;  %715 = vmatprep.subr.bf16.mxu1 %v769_v0 }
  0x28   :  { %696 = vmatpush3.bf16.msra.mxu0 %v760_v30  ;;  %716 = vmatpush3.bf16.msra.mxu1 %v768_v38 }
  0x29   :  { %697 = vmatprep.subr.bf16.mxu0 %v769_v0 }
  0x2a   :  { %686 = vmatmul.mubr.bf16.gmra.mxu1 %v757_v27  ;;  %254 = vmatmul.mubr.bf16.gmra.mxu0 %v757_v27 }
  0x2b   :  { %689 = vmatprep.mubr.msk.bf16.mxu1 %vm770_vm0, %v769_v0  ;;  %262 = vmatprep.mubr.bf16.mxu0 %v771_v3 }
  0x2c   :  { %698 = vmatpush3.bf16.msra.mxu0 %v761_v31 }
  0x2d   :  { %699 = vmatprep.subr.bf16.mxu0 %v769_v0 }
  0x30   :  { %700 = vmatpush3.bf16.msra.mxu0 %v762_v32 }
  0x31   :  { %701 = vmatprep.subr.bf16.mxu0 %v769_v0 }
  0x32   :  { %690 = vmatmul.mubr.bf16.gmra.mxu1 %v758_v28  ;;  %263 = vmatmul.mubr.bf16.gmra.mxu0 %v758_v28 }
  0x33   :  { %717 = vmatprep.mubr.msk.bf16.mxu1 %vm770_vm0, %v769_v0  ;;  %709 = vmatprep.mubr.msk.bf16.mxu0 %vm770_vm0, %v769_v0 }
  0x34   :  { %702 = vmatpush3.bf16.msra.mxu0 %v763_v33 }
  0x35   :  { %703 = vmatprep.subr.bf16.mxu0 %v769_v0 }
  0x38   :  { %704 = vmatpush3.bf16.msra.mxu0 %v764_v34 }
  0x39   :  { %705 = vmatprep.subr.bf16.mxu0 %v769_v0 }
  0x3c   :  { %706 = vmatpush3.bf16.msra.mxu0 %v765_v35 }
  0x3d   :  { %707 = vmatprep.subr.bf16.mxu0 %v769_v0 }
  0x40   :  { %708 = vmatpush3.bf16.msra.mxu0 %v766_v36 }
  0xe2   :  { %v306_v39 = vpop.f32.mrf.mxu1  ;;  %v245_v40 = vpop.f32.mrf.mxu0 }
  0xe3   :  { %v347_v47 = vrot.slane %v306_v39, 2 }
  0xe4   :  { %v683_v41 = vpop.f32.mrf.mxu1  ;;  %v247_v42 = vpop.f32.mrf.mxu0 }
  0xe5   :  { %v334_v48 = vrot.slane %v247_v42, 1 }
  0xe6   :  { %v309_v43 = vpop.f32.mrf.mxu1  ;;  %v249_v44 = vpop.f32.mrf.mxu0 }
  0xe7   :  { %v348_v49 = vrot.slane %v309_v43, 2 }
  0xe8   :  { %v684_v45 = vpop.f32.mrf.mxu1  ;;  %v251_v46 = vpop.f32.mrf.mxu0 }
  0xe9   :  { %v335_v50 = vrot.slane %v251_v46, 1  ;;  %v349_v57 = vsel %vm346_vm2, %v347_v47, %v348_v49 }
  0xea   :  { %v314_v51 = vpop.f32.mrf.mxu1  ;;  %v255_v52 = vpop.f32.mrf.mxu0 }
  0xeb   :  { %v336_v53 = vsel %vm333_vm1, %v334_v48, %v335_v50  ;;  %v350_v58 = vrot.slane %v314_v51, 2  ;;  %v626_v52 = vld [vmem:[%s979_s4] ss:$0 sm:$0xff] }
  0xec   :  { %v687_v54 = vpop.f32.mrf.mxu1  ;;  %v341_v55 = vadd.f32 %v336_v53, %v245_v40  ;;  %v256_v56 = vpop.f32.mrf.mxu0 }
  0xed   :  { %v337_v59 = vrot.slane %v256_v56, 1  ;;  %v351_v4 = vsel %vm346_vm2, %v348_v49, %v350_v58 }
  0xee   :  { %v317_v60 = vpop.f32.mrf.mxu1  ;;  %v354_v61 = vadd.f32 %v349_v57, %v341_v55  ;;  %v258_v62 = vpop.f32.mrf.mxu0 }
  0xef   :  { %v338_v0 = vsel %vm333_vm1, %v335_v50, %v337_v59  ;;  %v388_v19 = vrot.slane %v317_v60, 2  ;;  %v638_v60 = vld [vmem:[%s980_s6] ss:$0 sm:$0xff] }
  0xf0   :  { %v688_v1 = vpop.f32.mrf.mxu1  ;;  %v342_v2 = vadd.f32 %v338_v0, %v249_v44  ;;  %v260_v3 = vpop.f32.mrf.mxu0  ;;  %v362_v6 = vadd.f32 %v625_v63, %v354_v61 }
  0xf1   :  { %v376_v12 = vrot.slane %v260_v3, 1 }
  0xf2   :  { %v322_v5 = vpop.f32.mrf.mxu1  ;;  %v355_v7 = vadd.f32 %v351_v4, %v342_v2  ;;  %v264_v8 = vpop.f32.mrf.mxu0  ;;  %v364_v16 = vmax.f32 %v362_v6, 0.0 }
  0xf3   :  { %v389_v13 = vrot.slane %v322_v5, 2 }
  0xf4   :  { %v691_v9 = vpop.f32.mrf.mxu1  ;;  %v363_v10 = vadd.f32 %v625_v63, %v355_v7  ;;  %v266_v11 = vpop.f32.mrf.mxu0 }
  0xf5   :  { %v377_v14 = vrot.slane %v266_v11, 1  ;;  %v390_v25 = vsel %vm346_vm2, %v388_v19, %v389_v13 }
  0xf6   :  { %v325_v15 = vpop.f32.mrf.mxu1  ;;  %v365_v17 = vmax.f32 %v363_v10, 0.0  ;;  %v268_v18 = vpop.f32.mrf.mxu0 }
  0xf7   :  { %v378_v20 = vsel %vm333_vm1, %v376_v12, %v377_v14  ;;  %v391_v26 = vrot.slane %v325_v15, 2 }
  0xf8   :  { %v692_v21 = vpop.f32.mrf.mxu1  ;;  %v366_v22 = vadd.f32 %v365_v17, %v364_v16  ;;  %v383_v23 = vadd.f32 %v378_v20, %v258_v62  ;;  %v269_v24 = vpop.f32.mrf.mxu0 }
  0xf9   :  { %v379_v27 = vrot.slane %v269_v24, 1  ;;  %v392_v32 = vsel %vm346_vm2, %v389_v13, %v391_v26 }
  0xfa   :  { %v395_v28 = vadd.f32 %v390_v25, %v383_v23  ;;  %v367_v30 = vrot.slane %v366_v22, 4 }
  0xfb   :  { %v380_v29 = vsel %vm333_vm1, %v377_v14, %v379_v27 }
  0xfc   :  { %v384_v31 = vadd.f32 %v380_v29, %v264_v8  ;;  %v397_v33 = vadd.f32 %v625_v63, %v395_v28  ;;  %v368_v35 = vadd.f32 %v367_v30, %v366_v22 }
  0xfe   :  { %v396_v34 = vadd.f32 %v392_v32, %v384_v31  ;;  %v399_v37 = vmax.f32 %v397_v33, 0.0  ;;  %v369_v39 = vrot.slane %v368_v35, 2 }
 0x100   :  { %v398_v36 = vadd.f32 %v625_v63, %v396_v34  ;;  %v370_v42 = vadd.f32 %v369_v39, %v368_v35 }
 0x102   :  { %v400_v38 = vmax.f32 %v398_v36, 0.0  ;;  %v371_v45 = vrot.slane %v370_v42, 1 }
 0x104   :  { %v401_v40 = vadd.f32 %v400_v38, %v399_v37  ;;  %v372_v48 = vadd.f32 %v371_v45, %v370_v42 }
 0x106   :  { %v402_v41 = vrot.slane %v401_v40, 4 }
 0x108   :  { %v403_v43 = vadd.f32 %v402_v41, %v401_v40 }
 0x10a   :  { %v404_v44 = vrot.slane %v403_v43, 2 }
 0x10c   :  { %v405_v46 = vadd.f32 %v404_v44, %v403_v43 }
 0x10e   :  { %v406_v47 = vrot.slane %v405_v46, 1 }
 0x110   :  { %v407_v49 = vadd.f32 %v406_v47, %v405_v46 }
 0x112   :  { %v409_v50 = vsel %vm408_vm3, %v372_v48, %v407_v49 }
 0x113   :  { %v636_v51 = vpack.c.bf16 %v409_v50, %v409_v50 }
 0x115   :  { %710 = vmatmul.mubr.msk.bf16.vlgmr.msra.gmra.mxu0 %vm635_vm5, %v636_v51 }
 0x1d5   :  { %v518_v53 = vpop.f32.mrf.mxu0 }
 0x1d6   :  { %v519_v54 = vadd.f32 %v626_v52, %v518_v53 }
 0x1d7   :  { %v711_v55 = vpop.f32.mrf.mxu0 }
 0x1d8   :  { %v524_v56 = vmax.f32 %v519_v54, 0.0 }
 0x1d9   :  { %v521_v57 = vpop.f32.mrf.mxu0 }
 0x1da   :  { %v525_v58 = vpack.c.bf16 %v524_v56, %v524_v56 }
 0x1db   :  { %v712_v59 = vpop.f32.mrf.mxu0 }
 0x1dc   :  { %718 = vmatmul.mubr.msk.bf16.vlgmr.msra.gmra.mxu1 %vm549_vm6, %v525_v58 }
 0x29c   :  { %v587_v61 = vpop.f32.mrf.mxu1 }
 0x29d   :  { %v588_v62 = vadd.f32 %v638_v60, %v587_v61 }
 0x29e   :  { %v719_v63 = vpop.f32.mrf.mxu1 }
 0x29f   :  { %593 = vst [vmem:[%s981_s7] sm:$0xff] %v588_v62 }
 0x2a0   :  { %v590_v0 = vpop.f32.mrf.mxu1 }
 0x2a2   :  { %v720_v1 = vpop.f32.mrf.mxu1 }

</bundles_post_ra>
